<compile_context>
chip_gen: v6e
topology: v6e:2x2x1
jax: 0.10.0
libtpu: 0.0.40
codegen_flags: <defaults>
</compile_context>

<pallas_src>
import numpy as np
import jax
import jax.numpy as jnp
from jax.experimental import pallas as pl
from jax.experimental.pallas import tpu as pltpu


_TB_MAX = 64   # samples per grid step (conv matmuls get >= 256 rows at TB>=11)


# ------------------------------ fused kernel -------------------------------

def _lenet_kernel(x_ref, a1_ref, a2_ref, b_ref, g_ref, f2_ref, f3_ref,
                  out_ref, s1_ref, s2_ref, s3_ref):
    f32, bf16 = jnp.float32, jnp.bfloat16
    tb = x_ref.shape[0] // 28                       # samples in this block

    def shift_rows(m, k):
        # out[i] = m[(i + k) % rows]; wrapped rows only feed rows that the
        # valid outputs never consume (per-sample valid-row bookkeeping).
        if k == 0:
            return m
        return jnp.concatenate([m[k:, :], m[:k, :]], axis=0)

    def mm(a, b):
        return jnp.dot(a, b, preferred_element_type=f32)

    # ---- conv1 + bias + ReLU (fused K = 5*28 = 140) ------------------------
    x = x_ref[...].astype(bf16)                                   # (tb*28, 28)
    l1 = jnp.concatenate([shift_rows(x, kh) for kh in range(5)], axis=1)
    h1 = jnp.maximum(mm(l1, a1_ref[...]) + b_ref[0:1, :144], 0.0)  # (tb*28,144)

    # ---- pool1 (2x2 max, all on VPU) ---------------------------------------
    v1 = jnp.maximum(h1[:, :72], h1[:, 72:144])                    # W direction
    s1_ref[...] = v1
    u1 = jnp.maximum(s1_ref[pl.ds(0, 14 * tb, stride=2), :],       # H direction
                     s1_ref[pl.ds(1, 14 * tb, stride=2), :])       # (tb*14, 72)

    # ---- conv2 + bias + ReLU (fused K = 5*72 = 360) ------------------------
    u1b = u1.astype(bf16)
    l2 = jnp.concatenate([shift_rows(u1b, kh) for kh in range(5)], axis=1)
    h2 = jnp.maximum(mm(l2, a2_ref[...]) + b_ref[1:2, :128], 0.0)  # (tb*14,128)

    # ---- pool2 (2x2 max, all on VPU) ---------------------------------------
    v2 = jnp.maximum(h2[:, :64], h2[:, 64:128])
    s2_ref[...] = v2
    p2 = jnp.maximum(s2_ref[pl.ds(0, 7 * tb, stride=2), :],
                     s2_ref[pl.ds(1, 7 * tb, stride=2), :])        # (tb*7, 64)

    # ---- flatten (folded into fc1 packing) + fc1/fc2/fc3 -------------------
    s3_ref[...] = p2
    flat = jnp.concatenate(
        [s3_ref[pl.ds(r, tb, stride=7), :] for r in range(4)], axis=1)  # (tb,256)
    f1 = jnp.maximum(mm(flat.astype(bf16), g_ref[...]) + b_ref[2:3, :128], 0.0)
    f2 = jnp.maximum(mm(f1.astype(bf16), f2_ref[...]) + b_ref[3:4, :128], 0.0)
    out_ref[...] = mm(f2.astype(bf16), f3_ref[...]) + b_ref[4:5, :128]


# --------------------------- wrapper-side packing ---------------------------

def _conv_matrix(w, in_w):
    """w: (Cout, Cin, KH, KW) -> A: (KH*Cin*in_w, 2*Cout*(out_w//2)).
    Row index  : kh*(Cin*in_w) + ci*in_w + x          (x = input column)
    Col index  : parity*(Cout*half) + co*half + owh,   ow = 2*owh + parity
    A[row,col] = w[co, ci, kh, x - ow]  when 0 <= x-ow < KW, else 0.
    Even/odd output columns land in separate lane halves -> W-pool is a max of
    two contiguous lane slices in the kernel."""
    w = np.asarray(w, np.float32)
    cout, cin, kh_sz, kw_sz = w.shape
    out_w = in_w - kw_sz + 1
    half = out_w // 2
    a = np.zeros((kh_sz, cin, in_w, 2, cout, half), np.float32)
    for kh in range(kh_sz):
        for kw in range(kw_sz):
            for parity in range(2):
                for owh in range(half):
                    ow = 2 * owh + parity
                    a[kh, :, ow + kw, parity, :, owh] = w[:, :, kh, kw].T
    return a.reshape(kh_sz * cin * in_w, 2 * cout * half)


def pack_params(params):
    """One-time O(params) packing (host side): bf16 weights, f32 biases."""
    a1 = _conv_matrix(params["conv1_w"], 28)                       # (140, 144)
    a2 = _conv_matrix(params["conv2_w"], 12)                       # (360, 128)

    bias = np.zeros((8, 256), np.float32)
    c1b = np.asarray(params["conv1_b"], np.float32)
    c2b = np.asarray(params["conv2_b"], np.float32)
    l = np.arange(144); bias[0, :144] = c1b[(l % 72) // 12]
    l = np.arange(128); bias[1, :128] = c2b[(l % 64) // 4]
    bias[2, :120] = np.asarray(params["fc1_b"], np.float32)
    bias[3, :84] = np.asarray(params["fc2_b"], np.float32)
    bias[4, :10] = np.asarray(params["fc3_b"], np.float32)

    # fc1: fold the PyTorch (C,H,W) flatten into the weight layout.
    # flat lane = oh2*64 + co*4 + ow2  ->  fc1_w column co*16 + oh2*4 + ow2.
    w1 = np.asarray(params["fc1_w"], np.float32).reshape(120, 16, 4, 4)
    g = np.zeros((4, 16, 4, 128), np.float32)
    g[..., :120] = np.transpose(w1, (2, 1, 3, 0))                  # (oh2,co,ow2,n)
    g = g.reshape(256, 128)

    f2 = np.zeros((128, 128), np.float32)
    f2[:120, :84] = np.asarray(params["fc2_w"], np.float32).T
    f3 = np.zeros((128, 128), np.float32)
    f3[:84, :10] = np.asarray(params["fc3_w"], np.float32).T

    return {
        "a1": jnp.asarray(a1, jnp.bfloat16),
        "a2": jnp.asarray(a2, jnp.bfloat16),
        "bias": jnp.asarray(bias, jnp.float32),
        "g": jnp.asarray(g, jnp.bfloat16),
        "f2": jnp.asarray(f2, jnp.bfloat16),
        "f3": jnp.asarray(f3, jnp.bfloat16),
    }


# ------------------------------- LeNet model --------------------------------

def init_params(key):
    ks = jax.random.split(key, 10)
    s = 0.1
    return {
        "conv1_w": s * jax.random.normal(ks[0], (6, 1, 5, 5), jnp.float32),
        "conv1_b": s * jax.random.normal(ks[1], (6,), jnp.float32),
        "conv2_w": s * jax.random.normal(ks[2], (16, 6, 5, 5), jnp.float32),
        "conv2_b": s * jax.random.normal(ks[3], (16,), jnp.float32),
        "fc1_w": s * jax.random.normal(ks[4], (120, 16 * 4 * 4), jnp.float32),
        "fc1_b": s * jax.random.normal(ks[5], (120,), jnp.float32),
        "fc2_w": s * jax.random.normal(ks[6], (84, 120), jnp.float32),
        "fc2_b": s * jax.random.normal(ks[7], (84,), jnp.float32),
        "fc3_w": s * jax.random.normal(ks[8], (10, 84), jnp.float32),
        "fc3_b": s * jax.random.normal(ks[9], (10,), jnp.float32),
    }


def lenet_forward(packed, x_nchw):
    """x_nchw: (B, 1, 28, 28) f32 -> (B, 10) logits.  One fused Pallas kernel."""
    B = x_nchw.shape[0]
    assert x_nchw.shape[1:] == (1, 28, 28)
    x = x_nchw.astype(jnp.float32)

    tb = B if B <= _TB_MAX else _TB_MAX             # samples per grid step
    bp = tb * ((B + tb - 1) // tb)                  # padded batch
    if bp != B:
        x = jnp.pad(x, ((0, bp - B), (0, 0), (0, 0), (0, 0)))
    xs = x.reshape(bp * 28, 28)                     # free, metadata-only reshape

    const = lambda i: (0, 0)
    out = pl.pallas_call(
        _lenet_kernel,
        out_shape=jax.ShapeDtypeStruct((bp, 128), jnp.float32),
        grid=(bp // tb,),
        in_specs=[
            pl.BlockSpec((tb * 28, 28), lambda i: (i, 0)),   # rows-stacked image
            pl.BlockSpec((140, 144), const),                 # conv1 Toeplitz (bf16)
            pl.BlockSpec((360, 128), const),                 # conv2 Toeplitz (bf16)
            pl.BlockSpec((8, 256), const),                   # all biases (f32)
            pl.BlockSpec((256, 128), const),                 # fc1 (flatten folded)
            pl.BlockSpec((128, 128), const),                 # fc2
            pl.BlockSpec((128, 128), const),                 # fc3
        ],
        out_specs=pl.BlockSpec((tb, 128), lambda i: (i, 0)),
        scratch_shapes=[
            pltpu.VMEM((tb * 28, 72), jnp.float32),          # pool1 staging
            pltpu.VMEM((tb * 14, 64), jnp.float32),          # pool2 staging
            pltpu.VMEM((tb * 7, 64), jnp.float32),           # flatten staging
        ],
        compiler_params=pltpu.CompilerParams(
            dimension_semantics=("parallel",)),
    )(xs, packed["a1"], packed["a2"], packed["bias"],
      packed["g"], packed["f2"], packed["f3"])

    return out[:B, :10]


# --------------------------- pure-JAX reference -----------------------------

def lenet_reference(params, x):
    dn = ("NCHW", "OIHW", "NCHW")
    hp = jax.lax.Precision.HIGHEST
    h = jax.lax.conv_general_dilated(x, params["conv1_w"], (1, 1), "VALID",
                                     dimension_numbers=dn, precision=hp)
    h = jax.nn.relu(h + params["conv1_b"][None, :, None, None])
    h = jax.lax.reduce_window(h, -jnp.inf, jax.lax.max,
                              (1, 1, 2, 2), (1, 1, 2, 2), "VALID")
    h = jax.lax.conv_general_dilated(h, params["conv2_w"], (1, 1), "VALID",
                                     dimension_numbers=dn, precision=hp)
    h = jax.nn.relu(h + params["conv2_b"][None, :, None, None])
    h = jax.lax.reduce_window(h, -jnp.inf, jax.lax.max,
                              (1, 1, 2, 2), (1, 1, 2, 2), "VALID")
    h = h.reshape(h.shape[0], -1)
    h = jax.nn.relu(jnp.dot(h, params["fc1_w"].T, precision=hp) + params["fc1_b"])
    h = jax.nn.relu(jnp.dot(h, params["fc2_w"].T, precision=hp) + params["fc2_b"])
    return jnp.dot(h, params["fc3_w"].T, precision=hp) + params["fc3_b"]


if __name__ == "__main__":
    key = jax.random.PRNGKey(0)
    k_x, k_p = jax.random.split(key)
    # LeNet geometry (fc1 expects 16*4*4) fixes the input to (B, 1, 28, 28).
    x = jax.random.normal(k_x, (2, 1, 28, 28), jnp.float32)
    params = init_params(k_p)
    packed = pack_params(params)

    fwd = jax.jit(lenet_forward)

    # Small-batch correctness check (single grid step).
    logits = jax.block_until_ready(fwd(packed, x))
    assert logits.shape == (2, 10) and logits.dtype == jnp.float32
    ref = jax.block_until_ready(lenet_reference(params, x))
    assert jnp.allclose(logits, ref, rtol=6e-2, atol=6e-2), \
        float(jnp.max(jnp.abs(logits - ref)))

    # Batched path: 128 samples -> 2 parallel grid steps of 64 samples each.
    xb = jax.random.normal(jax.random.PRNGKey(1), (128, 1, 28, 28), jnp.float32)
    lb = jax.block_until_ready(fwd(packed, xb))
    refb = jax.block_until_ready(lenet_reference(params, xb))
    assert lb.shape == (128, 10)
    assert jnp.allclose(lb, refb, rtol=6e-2, atol=6e-2), \
        float(jnp.max(jnp.abs(lb - refb)))

    print("KERNEL_OK")
</pallas_src>

<mosaic_0001>
module attributes {stable_mosaic.version = 11 : i64} {
  func.func @_lenet_kernel(%arg0: i32, %arg1: memref<56x28xf32, #tpu.memory_space<vmem>>, %arg2: memref<140x144xbf16, #tpu.memory_space<vmem>>, %arg3: memref<360x128xbf16, #tpu.memory_space<vmem>>, %arg4: memref<8x256xf32, #tpu.memory_space<vmem>>, %arg5: memref<256x128xbf16, #tpu.memory_space<vmem>>, %arg6: memref<128x128xbf16, #tpu.memory_space<vmem>>, %arg7: memref<128x128xbf16, #tpu.memory_space<vmem>>, %arg8: memref<2x128xf32, #tpu.memory_space<vmem>>, %arg9: memref<56x72xf32, #tpu.memory_space<vmem>>, %arg10: memref<28x64xf32, #tpu.memory_space<vmem>>, %arg11: memref<14x64xf32, #tpu.memory_space<vmem>>) attributes {dimension_semantics = [#tpu.dimension_semantics<parallel>], iteration_bounds = array<i64: 1>, scalar_prefetch = 0 : i64, scratch_operands = 3 : i64, tpu.core_type = #tpu.core_type<tc>, window_params = [{transform_indices = @transform_0, window_bounds = array<i64: 56, 28>}, {pipeline_mode = #tpu.pipeline_mode<synchronous>, transform_indices = @transform_1, window_bounds = array<i64: 140, 144>}, {pipeline_mode = #tpu.pipeline_mode<synchronous>, transform_indices = @transform_2, window_bounds = array<i64: 360, 128>}, {pipeline_mode = #tpu.pipeline_mode<synchronous>, transform_indices = @transform_3, window_bounds = array<i64: 8, 256>}, {pipeline_mode = #tpu.pipeline_mode<synchronous>, transform_indices = @transform_4, window_bounds = array<i64: 256, 128>}, {pipeline_mode = #tpu.pipeline_mode<synchronous>, transform_indices = @transform_5, window_bounds = array<i64: 128, 128>}, {pipeline_mode = #tpu.pipeline_mode<synchronous>, transform_indices = @transform_6, window_bounds = array<i64: 128, 128>}, {transform_indices = @transform_7, window_bounds = array<i64: 2, 128>}]} {
    %c0 = arith.constant 0 : index
    %c0_0 = arith.constant 0 : index
    %0 = vector.load %arg1[%c0, %c0_0] : memref<56x28xf32, #tpu.memory_space<vmem>>, vector<56x28xf32>
    %1 = arith.truncf %0 : vector<56x28xf32> to vector<56x28xbf16>
    %2 = vector.extract_strided_slice %1 {offsets = [1, 0], sizes = [55, 28], strides = [1, 1]} : vector<56x28xbf16> to vector<55x28xbf16>
    %3 = vector.extract_strided_slice %1 {offsets = [0, 0], sizes = [1, 28], strides = [1, 1]} : vector<56x28xbf16> to vector<1x28xbf16>
    %4 = tpu.concatenate %2, %3 in 0 : vector<55x28xbf16>, vector<1x28xbf16> -> vector<56x28xbf16>
    %5 = vector.extract_strided_slice %1 {offsets = [2, 0], sizes = [54, 28], strides = [1, 1]} : vector<56x28xbf16> to vector<54x28xbf16>
    %6 = vector.extract_strided_slice %1 {offsets = [0, 0], sizes = [2, 28], strides = [1, 1]} : vector<56x28xbf16> to vector<2x28xbf16>
    %7 = tpu.concatenate %5, %6 in 0 : vector<54x28xbf16>, vector<2x28xbf16> -> vector<56x28xbf16>
    %8 = vector.extract_strided_slice %1 {offsets = [3, 0], sizes = [53, 28], strides = [1, 1]} : vector<56x28xbf16> to vector<53x28xbf16>
    %9 = vector.extract_strided_slice %1 {offsets = [0, 0], sizes = [3, 28], strides = [1, 1]} : vector<56x28xbf16> to vector<3x28xbf16>
    %10 = tpu.concatenate %8, %9 in 0 : vector<53x28xbf16>, vector<3x28xbf16> -> vector<56x28xbf16>
    %11 = vector.extract_strided_slice %1 {offsets = [4, 0], sizes = [52, 28], strides = [1, 1]} : vector<56x28xbf16> to vector<52x28xbf16>
    %12 = vector.extract_strided_slice %1 {offsets = [0, 0], sizes = [4, 28], strides = [1, 1]} : vector<56x28xbf16> to vector<4x28xbf16>
    %13 = tpu.concatenate %11, %12 in 0 : vector<52x28xbf16>, vector<4x28xbf16> -> vector<56x28xbf16>
    %14 = tpu.concatenate %1, %4, %7, %10, %13 in 1 : vector<56x28xbf16>, vector<56x28xbf16>, vector<56x28xbf16>, vector<56x28xbf16>, vector<56x28xbf16> -> vector<56x140xbf16>
    %c0_1 = arith.constant 0 : index
    %c0_2 = arith.constant 0 : index
    %15 = vector.load %arg2[%c0_1, %c0_2] : memref<140x144xbf16, #tpu.memory_space<vmem>>, vector<140x144xbf16>
    %cst = arith.constant dense<0.000000e+00> : vector<56x144xf32>
    %16 = tpu.matmul %14, %15, %cst {dimension_numbers = #tpu.dot_dimension_numbers<[1], [0], [0], [1], [0, 0, 1, 1], [], []>} : vector<56x140xbf16>, vector<140x144xbf16>, vector<56x144xf32> -> vector<56x144xf32>
    %c0_3 = arith.constant 0 : index
    %c0_4 = arith.constant 0 : index
    %17 = vector.load %arg4[%c0_3, %c0_4] : memref<8x256xf32, #tpu.memory_space<vmem>>, vector<1x144xf32>
    %18 = vector.broadcast %17 : vector<1x144xf32> to vector<56x144xf32>
    %19 = arith.addf %16, %18 : vector<56x144xf32>
    %cst_5 = arith.constant 0.000000e+00 : f32
    %20 = vector.broadcast %cst_5 : f32 to vector<56x144xf32>
    %21 = arith.maximumf %19, %20 : vector<56x144xf32>
    %22 = vector.extract_strided_slice %21 {offsets = [0, 0], sizes = [56, 72], strides = [1, 1]} : vector<56x144xf32> to vector<56x72xf32>
    %23 = vector.extract_strided_slice %21 {offsets = [0, 72], sizes = [56, 72], strides = [1, 1]} : vector<56x144xf32> to vector<56x72xf32>
    %24 = arith.maximumf %22, %23 : vector<56x72xf32>
    %c0_6 = arith.constant 0 : index
    %c0_7 = arith.constant 0 : index
    %25 = vector.load %arg9[%c0_6, %c0_7] : memref<56x72xf32, #tpu.memory_space<vmem>>, vector<56x72xf32>
    tpu.vector_store %arg9[%c0_6, %c0_7], %24 {strides = array<i32>} : memref<56x72xf32, #tpu.memory_space<vmem>>, vector<56x72xf32>,
    %c0_8 = arith.constant 0 : index
    %c0_9 = arith.constant 0 : index
    %26 = tpu.strided_load %arg9[%c0_8, %c0_9] {strides = array<i32: 2, 1>} : memref<56x72xf32, #tpu.memory_space<vmem>>, vector<28x72xf32>
    %c1 = arith.constant 1 : index
    %c0_10 = arith.constant 0 : index
    %27 = tpu.strided_load %arg9[%c1, %c0_10] {strides = array<i32: 2, 1>} : memref<56x72xf32, #tpu.memory_space<vmem>>, vector<28x72xf32>
    %28 = arith.maximumf %26, %27 : vector<28x72xf32>
    %29 = arith.truncf %28 : vector<28x72xf32> to vector<28x72xbf16>
    %30 = vector.extract_strided_slice %29 {offsets = [1, 0], sizes = [27, 72], strides = [1, 1]} : vector<28x72xbf16> to vector<27x72xbf16>
    %31 = vector.extract_strided_slice %29 {offsets = [0, 0], sizes = [1, 72], strides = [1, 1]} : vector<28x72xbf16> to vector<1x72xbf16>
    %32 = tpu.concatenate %30, %31 in 0 : vector<27x72xbf16>, vector<1x72xbf16> -> vector<28x72xbf16>
    %33 = vector.extract_strided_slice %29 {offsets = [2, 0], sizes = [26, 72], strides = [1, 1]} : vector<28x72xbf16> to vector<26x72xbf16>
    %34 = vector.extract_strided_slice %29 {offsets = [0, 0], sizes = [2, 72], strides = [1, 1]} : vector<28x72xbf16> to vector<2x72xbf16>
    %35 = tpu.concatenate %33, %34 in 0 : vector<26x72xbf16>, vector<2x72xbf16> -> vector<28x72xbf16>
    %36 = vector.extract_strided_slice %29 {offsets = [3, 0], sizes = [25, 72], strides = [1, 1]} : vector<28x72xbf16> to vector<25x72xbf16>
    %37 = vector.extract_strided_slice %29 {offsets = [0, 0], sizes = [3, 72], strides = [1, 1]} : vector<28x72xbf16> to vector<3x72xbf16>
    %38 = tpu.concatenate %36, %37 in 0 : vector<25x72xbf16>, vector<3x72xbf16> -> vector<28x72xbf16>
    %39 = vector.extract_strided_slice %29 {offsets = [4, 0], sizes = [24, 72], strides = [1, 1]} : vector<28x72xbf16> to vector<24x72xbf16>
    %40 = vector.extract_strided_slice %29 {offsets = [0, 0], sizes = [4, 72], strides = [1, 1]} : vector<28x72xbf16> to vector<4x72xbf16>
    %41 = tpu.concatenate %39, %40 in 0 : vector<24x72xbf16>, vector<4x72xbf16> -> vector<28x72xbf16>
    %42 = tpu.concatenate %29, %32, %35, %38, %41 in 1 : vector<28x72xbf16>, vector<28x72xbf16>, vector<28x72xbf16>, vector<28x72xbf16>, vector<28x72xbf16> -> vector<28x360xbf16>
    %c0_11 = arith.constant 0 : index
    %c0_12 = arith.constant 0 : index
    %43 = vector.load %arg3[%c0_11, %c0_12] : memref<360x128xbf16, #tpu.memory_space<vmem>>, vector<360x128xbf16>
    %cst_13 = arith.constant dense<0.000000e+00> : vector<28x128xf32>
    %44 = tpu.matmul %42, %43, %cst_13 {dimension_numbers = #tpu.dot_dimension_numbers<[1], [0], [0], [1], [0, 0, 1, 1], [], []>} : vector<28x360xbf16>, vector<360x128xbf16>, vector<28x128xf32> -> vector<28x128xf32>
    %c1_14 = arith.constant 1 : index
    %c0_15 = arith.constant 0 : index
    %45 = vector.load %arg4[%c1_14, %c0_15] : memref<8x256xf32, #tpu.memory_space<vmem>>, vector<1x128xf32>
    %46 = vector.broadcast %45 : vector<1x128xf32> to vector<28x128xf32>
    %47 = arith.addf %44, %46 : vector<28x128xf32>
    %cst_16 = arith.constant 0.000000e+00 : f32
    %48 = vector.broadcast %cst_16 : f32 to vector<28x128xf32>
    %49 = arith.maximumf %47, %48 : vector<28x128xf32>
    %50 = vector.extract_strided_slice %49 {offsets = [0, 0], sizes = [28, 64], strides = [1, 1]} : vector<28x128xf32> to vector<28x64xf32>
    %51 = vector.extract_strided_slice %49 {offsets = [0, 64], sizes = [28, 64], strides = [1, 1]} : vector<28x128xf32> to vector<28x64xf32>
    %52 = arith.maximumf %50, %51 : vector<28x64xf32>
    %c0_17 = arith.constant 0 : index
    %c0_18 = arith.constant 0 : index
    %53 = vector.load %arg10[%c0_17, %c0_18] : memref<28x64xf32, #tpu.memory_space<vmem>>, vector<28x64xf32>
    tpu.vector_store %arg10[%c0_17, %c0_18], %52 {strides = array<i32>} : memref<28x64xf32, #tpu.memory_space<vmem>>, vector<28x64xf32>,
    %c0_19 = arith.constant 0 : index
    %c0_20 = arith.constant 0 : index
    %54 = tpu.strided_load %arg10[%c0_19, %c0_20] {strides = array<i32: 2, 1>} : memref<28x64xf32, #tpu.memory_space<vmem>>, vector<14x64xf32>
    %c1_21 = arith.constant 1 : index
    %c0_22 = arith.constant 0 : index
    %55 = tpu.strided_load %arg10[%c1_21, %c0_22] {strides = array<i32: 2, 1>} : memref<28x64xf32, #tpu.memory_space<vmem>>, vector<14x64xf32>
    %56 = arith.maximumf %54, %55 : vector<14x64xf32>
    %c0_23 = arith.constant 0 : index
    %c0_24 = arith.constant 0 : index
    %57 = vector.load %arg11[%c0_23, %c0_24] : memref<14x64xf32, #tpu.memory_space<vmem>>, vector<14x64xf32>
    tpu.vector_store %arg11[%c0_23, %c0_24], %56 {strides = array<i32>} : memref<14x64xf32, #tpu.memory_space<vmem>>, vector<14x64xf32>,
    %c0_25 = arith.constant 0 : index
    %c0_26 = arith.constant 0 : index
    %58 = tpu.strided_load %arg11[%c0_25, %c0_26] {strides = array<i32: 7, 1>} : memref<14x64xf32, #tpu.memory_space<vmem>>, vector<2x64xf32>
    %c1_27 = arith.constant 1 : index
    %c0_28 = arith.constant 0 : index
    %59 = tpu.strided_load %arg11[%c1_27, %c0_28] {strides = array<i32: 7, 1>} : memref<14x64xf32, #tpu.memory_space<vmem>>, vector<2x64xf32>
    %c2 = arith.constant 2 : index
    %c0_29 = arith.constant 0 : index
    %60 = tpu.strided_load %arg11[%c2, %c0_29] {strides = array<i32: 7, 1>} : memref<14x64xf32, #tpu.memory_space<vmem>>, vector<2x64xf32>
    %c3 = arith.constant 3 : index
    %c0_30 = arith.constant 0 : index
    %61 = tpu.strided_load %arg11[%c3, %c0_30] {strides = array<i32: 7, 1>} : memref<14x64xf32, #tpu.memory_space<vmem>>, vector<2x64xf32>
    %62 = tpu.concatenate %58, %59, %60, %61 in 1 : vector<2x64xf32>, vector<2x64xf32>, vector<2x64xf32>, vector<2x64xf32> -> vector<2x256xf32>
    %63 = arith.truncf %62 : vector<2x256xf32> to vector<2x256xbf16>
    %c0_31 = arith.constant 0 : index
    %c0_32 = arith.constant 0 : index
    %64 = vector.load %arg5[%c0_31, %c0_32] : memref<256x128xbf16, #tpu.memory_space<vmem>>, vector<256x128xbf16>
    %cst_33 = arith.constant dense<0.000000e+00> : vector<2x128xf32>
    %65 = tpu.matmul %63, %64, %cst_33 {dimension_numbers = #tpu.dot_dimension_numbers<[1], [0], [0], [1], [0, 0, 1, 1], [], []>} : vector<2x256xbf16>, vector<256x128xbf16>, vector<2x128xf32> -> vector<2x128xf32>
    %c2_34 = arith.constant 2 : index
    %c0_35 = arith.constant 0 : index
    %66 = vector.load %arg4[%c2_34, %c0_35] : memref<8x256xf32, #tpu.memory_space<vmem>>, vector<1x128xf32>
    %67 = vector.broadcast %66 : vector<1x128xf32> to vector<2x128xf32>
    %68 = arith.addf %65, %67 : vector<2x128xf32>
    %cst_36 = arith.constant 0.000000e+00 : f32
    %69 = vector.broadcast %cst_36 : f32 to vector<2x128xf32>
    %70 = arith.maximumf %68, %69 : vector<2x128xf32>
    %71 = arith.truncf %70 : vector<2x128xf32> to vector<2x128xbf16>
    %c0_37 = arith.constant 0 : index
    %c0_38 = arith.constant 0 : index
    %72 = vector.load %arg6[%c0_37, %c0_38] : memref<128x128xbf16, #tpu.memory_space<vmem>>, vector<128x128xbf16>
    %cst_39 = arith.constant dense<0.000000e+00> : vector<2x128xf32>
    %73 = tpu.matmul %71, %72, %cst_39 {dimension_numbers = #tpu.dot_dimension_numbers<[1], [0], [0], [1], [0, 0, 1, 1], [], []>} : vector<2x128xbf16>, vector<128x128xbf16>, vector<2x128xf32> -> vector<2x128xf32>
    %c3_40 = arith.constant 3 : index
    %c0_41 = arith.constant 0 : index
    %74 = vector.load %arg4[%c3_40, %c0_41] : memref<8x256xf32, #tpu.memory_space<vmem>>, vector<1x128xf32>
    %75 = vector.broadcast %74 : vector<1x128xf32> to vector<2x128xf32>
    %76 = arith.addf %73, %75 : vector<2x128xf32>
    %cst_42 = arith.constant 0.000000e+00 : f32
    %77 = vector.broadcast %cst_42 : f32 to vector<2x128xf32>
    %78 = arith.maximumf %76, %77 : vector<2x128xf32>
    %79 = arith.truncf %78 : vector<2x128xf32> to vector<2x128xbf16>
    %c0_43 = arith.constant 0 : index
    %c0_44 = arith.constant 0 : index
    %80 = vector.load %arg7[%c0_43, %c0_44] : memref<128x128xbf16, #tpu.memory_space<vmem>>, vector<128x128xbf16>
    %cst_45 = arith.constant dense<0.000000e+00> : vector<2x128xf32>
    %81 = tpu.matmul %79, %80, %cst_45 {dimension_numbers = #tpu.dot_dimension_numbers<[1], [0], [0], [1], [0, 0, 1, 1], [], []>} : vector<2x128xbf16>, vector<128x128xbf16>, vector<2x128xf32> -> vector<2x128xf32>
    %c4 = arith.constant 4 : index
    %c0_46 = arith.constant 0 : index
    %82 = vector.load %arg4[%c4, %c0_46] : memref<8x256xf32, #tpu.memory_space<vmem>>, vector<1x128xf32>
    %83 = vector.broadcast %82 : vector<1x128xf32> to vector<2x128xf32>
    %84 = arith.addf %81, %83 : vector<2x128xf32>
    %c0_47 = arith.constant 0 : index
    %c0_48 = arith.constant 0 : index
    %85 = vector.load %arg8[%c0_47, %c0_48] : memref<2x128xf32, #tpu.memory_space<vmem>>, vector<2x128xf32>
    tpu.vector_store %arg8[%c0_47, %c0_48], %84 {strides = array<i32>} : memref<2x128xf32, #tpu.memory_space<vmem>>, vector<2x128xf32>,
    return
  }
  func.func @transform_0(%arg0: i32) -> (i32, i32) {
    %c0_i32 = arith.constant 0 : i32
    %c0_i32_0 = arith.constant 0 : i32
    return %arg0, %c0_i32 : i32, i32
  }
  func.func @transform_1(%arg0: i32) -> (i32, i32) {
    %c0_i32 = arith.constant 0 : i32
    %c0_i32_0 = arith.constant 0 : i32
    %c0_i32_1 = arith.constant 0 : i32
    return %c0_i32, %c0_i32_0 : i32, i32
  }
  func.func @transform_2(%arg0: i32) -> (i32, i32) {
    %c0_i32 = arith.constant 0 : i32
    %c0_i32_0 = arith.constant 0 : i32
    %c0_i32_1 = arith.constant 0 : i32
    return %c0_i32, %c0_i32_0 : i32, i32
  }
  func.func @transform_3(%arg0: i32) -> (i32, i32) {
    %c0_i32 = arith.constant 0 : i32
    %c0_i32_0 = arith.constant 0 : i32
    %c0_i32_1 = arith.constant 0 : i32
    return %c0_i32, %c0_i32_0 : i32, i32
  }
  func.func @transform_4(%arg0: i32) -> (i32, i32) {
    %c0_i32 = arith.constant 0 : i32
    %c0_i32_0 = arith.constant 0 : i32
    %c0_i32_1 = arith.constant 0 : i32
    return %c0_i32, %c0_i32_0 : i32, i32
  }
  func.func @transform_5(%arg0: i32) -> (i32, i32) {
    %c0_i32 = arith.constant 0 : i32
    %c0_i32_0 = arith.constant 0 : i32
    %c0_i32_1 = arith.constant 0 : i32
    return %c0_i32, %c0_i32_0 : i32, i32
  }
  func.func @transform_6(%arg0: i32) -> (i32, i32) {
    %c0_i32 = arith.constant 0 : i32
    %c0_i32_0 = arith.constant 0 : i32
    %c0_i32_1 = arith.constant 0 : i32
    return %c0_i32, %c0_i32_0 : i32, i32
  }
  func.func @transform_7(%arg0: i32) -> (i32, i32) {
    %c0_i32 = arith.constant 0 : i32
    %c0_i32_0 = arith.constant 0 : i32
    return %arg0, %c0_i32 : i32, i32
  }
}

</mosaic_0001>

<bundles_post_ra>
// kernel: lenet_forward.1
= control target key start
LH: loop header
LB: loop body
LE: loop exit
PB: predicated region body
PF: predicated region fallthrough
CT: control target
= control target key end

     0   :  { %12 = vsyncpa [#allocation6], 0  ;;  %s2296_s0 = inlined_call_operand.hbm [shape: f32[56,28], index: 0, kind: input, shape index: {}]   ;;  %s2297_s1 = inlined_call_operand.hbm [shape: bf16[140,144], index: 1, kind: input, shape index: {}]   ;;  %s2298_s2 = inlined_call_operand.hbm [shape: bf16[360,128], index: 2, kind: input, shape index: {}]   ;;  %s2299_s3 = inlined_call_operand.hbm [shape: f32[8,256], index: 3, kind: input, shape index: {}]   ;;  %s2300_s4 = inlined_call_operand.hbm [shape: bf16[256,128], index: 4, kind: input, shape index: {}]   ;;  %s2301_s5 = inlined_call_operand.hbm [shape: bf16[128,128], index: 5, kind: input, shape index: {}]   ;;  %s2302_s6 = inlined_call_operand.hbm [shape: bf16[128,128], index: 6, kind: input, shape index: {}]   ;;  %s2303_s7 = inlined_call_operand.hbm [shape: f32[2,128], index: 7, kind: output, shape index: {}]  }
   0x1   :  { %13 = vsyncpa [#allocation9], 0 }
   0x2   :  { %14 = vsyncpa [#allocation12], 0 }
   0x3   :  { %15 = vsyncpa [#allocation15], 0 }
   0x4   :  { %16 = vsyncpa [#allocation7], 0  ;;  %s1956_s24 = smov [#allocation8]   ;;  %s1957_s26 = smov [#allocation11]  }
   0x5   :  { %s34_s25 = sshll.u32 %s1956_s24, 4  ;;  %s59_s27 = sshll.u32 %s1957_s26, 4  ;;  %s35_s25 = int_to_ptr.vmem [resolvable:$true] %s34_s25  ;;  %s60_s27 = int_to_ptr.vmem [resolvable:$true] %s59_s27 }
   0x6   :  { %s1794_s28 = scalar_lea.vmem %s35_s25, 2304  ;;  %p1799_p1 = scmp.lt.s32.totalorder %s35_s25, %s35_s25 }
   0x7   :  { %p1795_p0 = scmp.ne.s32.totalorder %s35_s25, %s1794_s28  ;;  %p1800_p2 = scmp.lt.s32.totalorder %s1794_s28, %s1794_s28 }
   0x9   :  { %p1801_p3 = por %p1800_p2, %p1799_p1 }
   0xb   :  { %p1802_p4 = pnand %p1801_p3, %p1795_p0 }
   0xd   :  { %1805 = shalt.err (!%p1802_p4)
}
   0xe   :  { %s1958_s29 = smov 128   ;;  %s1959_s30 = smov 8  }
   0xf   :  { %40 = dma.hbm_to_vmem [thread:$0]  %s2297_s1, 2304, %s35_s25, [#allocation9], %s1958_s29, %s1958_s29, %s1959_s30  }
  0x10   :  { %s1814_s10 = scalar_lea.vmem %s60_s27, 256  ;;  %p1819_p6 = scmp.lt.s32.totalorder %s60_s27, %s60_s27 }
  0x11   :  { %p1815_p5 = scmp.ne.s32.totalorder %s60_s27, %s1814_s10  ;;  %p1820_p7 = scmp.lt.s32.totalorder %s1814_s10, %s1814_s10 }
  0x13   :  { %p1821_p8 = por %p1820_p7, %p1819_p6 }
  0x15   :  { %p1822_p9 = pnand %p1821_p8, %p1815_p5 }
  0x17   :  { %1825 = shalt.err (!%p1822_p9)
}
  0x18   :  { %62 = dma.hbm_to_vmem [thread:$0]  %s2299_s3, 256, %s60_s27, [#allocation12]  }
  0x19   :  { %s1960_s13 = smov [#allocation14]   ;;  %s1961_s15 = smov [#allocation5]  }
  0x1a   :  { %s80_s14 = sshll.u32 %s1960_s13, 4  ;;  %s22_s16 = sshll.u32 %s1961_s15, 4  ;;  %s81_s14 = int_to_ptr.vmem [resolvable:$true] %s80_s14  ;;  %s23_s16 = int_to_ptr.vmem [resolvable:$true] %s22_s16 }
  0x1b   :  { %s1834_s17 = scalar_lea.vmem %s81_s14, 1024  ;;  %p1839_p11 = scmp.lt.s32.totalorder %s81_s14, %s81_s14 }
  0x1c   :  { %p1835_p10 = scmp.ne.s32.totalorder %s81_s14, %s1834_s17  ;;  %p1840_p12 = scmp.lt.s32.totalorder %s1834_s17, %s1834_s17 }
  0x1e   :  { %p1841_p13 = por %p1840_p12, %p1839_p11 }
  0x20   :  { %p1842_p0 = pnand %p1841_p13, %p1835_p10 }
  0x22   :  { %1845 = shalt.err (!%p1842_p0)
}
  0x23   :  { %s1962_s1 = smov 64   ;;  %s1963_s18 = smov 4  }
  0x24   :  { %86 = dma.hbm_to_vmem [thread:$0]  %s2301_s5, 1024, %s81_s14, [#allocation15], %s1962_s1, %s1962_s1, %s1963_s18  }
  0x25   :  { %s1854_s20 = scalar_lea.vmem %s23_s16, 896  ;;  %p1859_p2 = scmp.lt.s32.totalorder %s23_s16, %s23_s16 }
  0x26   :  { %p1855_p1 = scmp.ne.s32.totalorder %s23_s16, %s1854_s20  ;;  %p1860_p3 = scmp.lt.s32.totalorder %s1854_s20, %s1854_s20 }
  0x28   :  { %p1861_p4 = por %p1860_p3, %p1859_p2 }
  0x2a   :  { %p1862_p5 = pnand %p1861_p4, %p1855_p1 }
  0x2c   :  { %1865 = shalt.err (!%p1862_p5)
}
  0x2d   :  { %28 = dma.hbm_to_vmem [thread:$0]  %s2296_s0, 896, %s23_s16, [#allocation6], %s1958_s29, %s1958_s29, %s1959_s30  }
  0x2e   :  { %s1964_s23 = smov [#allocation10]   ;;  %s1965_s25 = smov [#allocation13]  }
  0x2f   :  { %s46_s24 = sshll.u32 %s1964_s23, 4  ;;  %s68_s26 = sshll.u32 %s1965_s25, 4  ;;  %s47_s24 = int_to_ptr.vmem [resolvable:$true] %s46_s24  ;;  %s69_s26 = int_to_ptr.vmem [resolvable:$true] %s68_s26 }
  0x30   :  { %s1874_s5 = scalar_lea.vmem %s47_s24, 2880  ;;  %p1879_p7 = scmp.lt.s32.totalorder %s47_s24, %s47_s24 }
  0x31   :  { %p1875_p6 = scmp.ne.s32.totalorder %s47_s24, %s1874_s5  ;;  %p1880_p8 = scmp.lt.s32.totalorder %s1874_s5, %s1874_s5 }
  0x33   :  { %p1881_p9 = por %p1880_p8, %p1879_p7 }
  0x35   :  { %p1882_p10 = pnand %p1881_p9, %p1875_p6 }
  0x37   :  { %1885 = shalt.err (!%p1882_p10)
}
  0x38   :  { %52 = dma.hbm_to_vmem [thread:$0]  %s2298_s2, 2880, %s47_s24, [#allocation9], %s1962_s1, %s1962_s1, %s1963_s18  }
  0x39   :  { %s1894_s0 = scalar_lea.vmem %s69_s26, 2048  ;;  %p1899_p12 = scmp.lt.s32.totalorder %s69_s26, %s69_s26 }
  0x3a   :  { %p1895_p11 = scmp.ne.s32.totalorder %s69_s26, %s1894_s0  ;;  %p1900_p13 = scmp.lt.s32.totalorder %s1894_s0, %s1894_s0 }
  0x3c   :  { %p1901_p0 = por %p1900_p13, %p1899_p12 }
  0x3e   :  { %p1902_p1 = pnand %p1901_p0, %p1895_p11 }
  0x40   :  { %1905 = shalt.err (!%p1902_p1)
}
  0x41   :  { %74 = dma.hbm_to_vmem [thread:$0]  %s2300_s4, 2048, %s69_s26, [#allocation12], %s1962_s1, %s1962_s1, %s1963_s18  }
  0x42   :  { %s1966_s8 = smov [#allocation16]  }
  0x43   :  { %s92_s9 = sshll.u32 %s1966_s8, 4  ;;  %s93_s9 = int_to_ptr.vmem [resolvable:$true] %s92_s9 }
  0x44   :  { %s1914_s10 = scalar_lea.vmem %s93_s9, 1024  ;;  %p1919_p3 = scmp.lt.s32.totalorder %s93_s9, %s93_s9 }
  0x45   :  { %p1915_p2 = scmp.ne.s32.totalorder %s93_s9, %s1914_s10  ;;  %p1920_p4 = scmp.lt.s32.totalorder %s1914_s10, %s1914_s10 }
  0x47   :  { %p1921_p5 = por %p1920_p4, %p1919_p3 }
  0x49   :  { %p1922_p6 = pnand %p1921_p5, %p1915_p2 }
  0x4b   :  { %1925 = shalt.err (!%p1922_p6)
}
  0x4c   :  { %98 = dma.hbm_to_vmem [thread:$0]  %s2302_s6, 1024, %s93_s9, [#allocation15], %s1962_s1, %s1962_s1, %s1963_s18  }
  0x4d   :  { %1946 = dma.done.wait [#allocation6], 896  }
  0x4e   :  { %1947 = vsyncadd [#allocation6], 4294966400 }
  0x4f   :  { %1948 = dma.done.wait [#allocation9], 5184  }
  0x50   :  { %1949 = vsyncadd [#allocation9], 4294962112 }
  0x51   :  { %1950 = dma.done.wait [#allocation12], 2304  }
  0x52   :  { %1951 = vsyncadd [#allocation12], 4294964992 }
  0x53   :  { %1952 = dma.done.wait [#allocation15], 2048  }
  0x54   :  { %1953 = vsyncadd [#allocation15], 4294965248  ;;  %v121_v0 = vld [vmem:[#allocation5] sm:$0xff]  ;;  %v122_v1 = vld [vmem:[#allocation5 + $0x8] sm:$0xff]  ;;  %vm132_vm0 = vsmask.f32 7424 }
  0x55   :  { %v123_v2 = vld [vmem:[#allocation5 + $0x10] sm:$0xff]  ;;  %v124_v3 = vld [vmem:[#allocation5 + $0x18] sm:$0xff]  ;;  %v2057_v4 = vpack.c.bf16 %v122_v1, %v121_v0  ;;  %v125_v5 = vld [vmem:[#allocation5 + $0x20] sm:$0xff]  ;;  %vm188_vm1 = vsmask.f32 6400  ;;  %vm175_vm2 = vcmask 1046528  }
  0x56   :  { %v126_v6 = vld [vmem:[#allocation5 + $0x28] sm:$0xff]  ;;  %v2059_v7 = vpack.c.bf16 %v124_v3, %v123_v2  ;;  %v127_v15 = vld [vmem:[#allocation5 + $0x30] sm:$0xff]  ;;  %v1707_v24 = vld [vmem:[#allocation8 + $0x64] ss:$8 sps:$4 sm:$0xff]   ;;  %vm213_vm3 = vcmask 1045504   ;;  %s1967_s4 = smov 28  }
  0x57   :  { %v2061_v8 = vpack.c.bf16 %v126_v6, %v125_v5  ;;  %v2064_v9 = vshrl.u32 %v2057_v4, 16  ;;  %v2067_v10 = vshll.u32 %v2057_v4, 16  ;;  %v1704_v11 = vld [vmem:[#allocation8 + $0x74] ss:$8 sps:$4 sm:$0xff]   ;;  %v176_v14 = vrot.slane %v2057_v4, 1  ;;  %s1968_s6 = smov 84  }
  0x58   :  { %v141_v12 = vshll.u32 %v2059_v7, 16  ;;  %v145_v13 = vshrl.u32 %v2059_v7, 16  ;;  %v1706_v16 = vld [vmem:[#allocation8 + $0x70] ss:$8 sps:$4 sm:$0xff]   ;;  %436 = vmatprep.subr.bf16.mxu0 %v1704_v11  ;;  %v177_v27 = vrot.slane %v2059_v7, 1  ;;  %v214_v31 = vrot.slane %v2057_v4, 2 }
  0x59   :  { %v138_v17 = vrot.slane %v2067_v10, 1  ;;  %v189_v18 = vrot.slane %v2064_v9, 1  ;;  %v190_v19 = vrot.slane %v2067_v10, 2  ;;  %v149_v20 = vshll.u32 %v2061_v8, 16  ;;  %437 = vmatpush1.bf16.msra.mxu0 %v1706_v16  ;;  %v1709_v28 = vld [vmem:[#allocation8 + $0x60] ss:$8 sps:$4 sm:$0xff]  }
  0x5a   :  { %v143_v21 = vrot.slane %v141_v12, 1  ;;  %v192_v22 = vrot.slane %v145_v13, 1  ;;  %v193_v23 = vrot.slane %v141_v12, 2  ;;  %v1710_v29 = vld [vmem:[#allocation8 + $0x54] ss:$8 sps:$4 sm:$0xff]   ;;  %v215_v32 = vrot.slane %v2059_v7, 2  ;;  %438 = vmatprep.subr.bf16.mxu0 %v1707_v24 }
  0x5b   :  { %v139_v25 = vor.u32 %v138_v17, %v2064_v9  ;;  %v191_v26 = vor.u32 %v190_v19, %v189_v18  ;;  %v153_v33 = vshrl.u32 %v2061_v8, 16  ;;  %v2082_v35 = vpack.c.bf16 %v127_v15, %v127_v15  ;;  %v1712_v38 = vld [vmem:[#allocation8 + $0x50] ss:$8 sps:$4 sm:$0xff]   ;;  %v1713_v43 = vld [vmem:[#allocation8 + $0x44] ss:$8 sps:$4 sm:$0xff]   ;;  %s1969_s12 = smov 56  }
  0x5c   :  { %v194_v30 = vor.u32 %v193_v23, %v192_v22  ;;  %v151_v37 = vrot.slane %v149_v20, 1  ;;  %v178_v39 = vsel %vm175_vm2, %v176_v14, %v177_v27  ;;  %v147_v40 = vor.u32 %v145_v13, %v143_v21  ;;  %v1715_v48 = vld [vmem:[#allocation8 + $0x40] ss:$8 sps:$4 sm:$0xff]   ;;  %s1970_s13 = smov 112   ;;  %v1716_v53 = vld [vmem:[#allocation8 + $0x34] ss:$8 sps:$4 sm:$0xff]  }
  0x5d   :  { %v144_v34 = vsel %vm132_vm0, %v139_v25, %v143_v21  ;;  %439 = vmatpush1.bf16.msra.mxu0 %v1709_v28  ;;  %v196_v41 = vrot.slane %v153_v33, 1  ;;  %v197_v42 = vrot.slane %v149_v20, 2  ;;  %v216_v44 = vsel %vm213_vm3, %v214_v31, %v215_v32  ;;  %v1718_v56 = vld [vmem:[#allocation8 + $0x30] ss:$8 sps:$4 sm:$0xff]   ;;  %v1719_v61 = vld [vmem:[#allocation8 + $0x24] ss:$8 sps:$4 sm:$0xff]  }
  0x5e   :  { %227 = vrot.lane.b32.xlu0 %v144_v34, %s1967_s4  ;;  %v195_v36 = vsel %vm188_vm1, %v191_v26, %v194_v30  ;;  %440 = vmatprep.subr.bf16.mxu0 %v1710_v29  ;;  %v179_v45 = vrot.slane %v2061_v8, 1  ;;  %v157_v46 = vshll.u32 %v2082_v35, 16  ;;  %v161_v47 = vshrl.u32 %v2082_v35, 16  ;;  %v1721_v3 = vld [vmem:[#allocation8 + $0x20] ss:$8 sps:$4 sm:$0xff]   ;;  %s1971_s14 = smov 16  }
  0x5f   :  { %245 = vrot.lane.b32.xlu1 %v195_v36, %s1968_s6  ;;  %v152_v49 = vsel %vm132_vm0, %v147_v40, %v151_v37  ;;  %v198_v50 = vor.u32 %v197_v42, %v196_v41  ;;  %v217_v51 = vrot.slane %v2061_v8, 2  ;;  %v181_v52 = vrot.slane %v2082_v35, 1  ;;  %v1722_v5 = vld [vmem:[#allocation8 + $0x14] ss:$8 sps:$4 sm:$0xff]   ;;  %v1724_v12 = vld [vmem:[#allocation8 + $0x10] ss:$8 sps:$4 sm:$0xff]  }
  0x60   :  { %v180_v54 = vsel %vm175_vm2, %v177_v27, %v179_v45  ;;  %v219_v55 = vrot.slane %v2082_v35, 2  ;;  %v159_v57 = vrot.slane %v157_v46, 1  ;;  %v200_v58 = vrot.slane %v161_v47, 1  ;;  %v1730_v17 = vld [vmem:[#allocation8 + $0x80] ss:$8 sps:$4 sm:$0x3f]  }
  0x61   :  { %441 = vmatpush1.bf16.msra.mxu0 %v1712_v38  ;;  %v201_v59 = vrot.slane %v157_v46, 2  ;;  %v165_v60 = vrot.slane %v2067_v10, 5  ;;  %vm167_vm4 = vcmask 1043456   ;;  %vm168_vm5 = vsmask.f32 3328  ;;  %s1972_s15 = smov 72  }
  0x62   :  { %236 = vrot.lane.b32.xlu0 %v178_v39, %s1969_s12  ;;  %442 = vmatprep.subr.bf16.mxu0 %v1713_v43  ;;  %v199_v62 = vsel %vm188_vm1, %v194_v30, %v198_v50  ;;  %v155_v63 = vor.u32 %v153_v33, %v151_v37  ;;  %v205_v0 = vrot.slane %v2064_v9, 5  ;;  %v206_v1 = vrot.slane %v2067_v10, 6  ;;  %v1725_v10 = vld [vmem:[#allocation8 + $0x4] ss:$8 sps:$4 sm:$0xff]   ;;  %vm169_vm9 = vmand %vm167_vm4, %vm168_vm5  ;;  %v1727_v19 = vld [vmem:[#allocation8] ss:$8 sps:$4 sm:$0xff]  }
  0x63   :  { %254 = vrot.lane.b32.xlu1 %v216_v44, %s1970_s13  ;;  %v218_v2 = vsel %vm213_vm3, %v215_v32, %v217_v51  ;;  %vm184_vm6 = vcmask 1042432   ;;  %vm210_vm7 = vsmask.f32 2304  ;;  %v202_v11 = vor.u32 %v201_v59, %v200_v58  ;;  %v1728_v18 = vld [vmem:[#allocation8 + $0x84] ss:$8 sps:$4 sm:$0x3f]  }
  0x64   :  { %v160_v6 = vsel %vm132_vm0, %v155_v63, %v159_v57  ;;  %v182_v9 = vsel %vm175_vm2, %v179_v45, %v181_v52  ;;  %vm222_vm8 = vcmask 1041408   ;;  %v163_v14 = vor.u32 %v161_v47, %v159_v57  ;;  %vm211_vm10 = vmand %vm184_vm6, %vm210_vm7  ;;  %s1973_s16 = smov 88   ;;  %s1974_s17 = smov 32  }
  0x65   :  { %443 = vmatpush1.bf16.msra.mxu0 %v1715_v48  ;;  %v203_v13 = vsel %vm188_vm1, %v198_v50, %v202_v11  ;;  %v220_v15 = vsel %vm213_vm3, %v217_v51, %v219_v55  ;;  %v183_v16 = vrot.slane %v2057_v4, 5  ;;  %v207_v21 = vor.u32 %v206_v1, %v205_v0 }
  0x66   :  { %229 = vrot.lane.b32.xlu0 %v152_v49, %s1967_s4  ;;  %444 = vmatprep.subr.bf16.mxu0 %v1716_v53  ;;  %v170_v20 = vsel %vm169_vm9, %v163_v14, %v165_v60  ;;  %v221_v23 = vrot.slane %v2057_v4, 6  ;;  %v431_v24 = vsel %vm213_vm3, %v1730_v17, 0  ;;  %vm262_vm11 = vcmask 228352   ;;  %v320_v60 = vld [vmem:[#allocation11] ss:$8 sm:$0x3] }
  0x67   :  { %238 = vrot.lane.b32.xlu1 %v180_v54, %s1969_s12  ;;  %v187_v22 = vsel %vm184_vm6, %v181_v52, %v183_v16  ;;  %v212_v25 = vsel %vm211_vm10, %v202_v11, %v207_v21  ;;  %vm271_vm12 = vcmask 457728   ;;  %vm420_vm13 = vcmask 97280  }
  0x68   :  { %v225_v26 = vsel %vm222_vm8, %v219_v55, %v221_v23  ;;  %vm280_vm14 = vcmask 687104   ;;  %vm289_vm15 = vcmask 916480   ;;  %v322_v57 = vlaneseq }
  0x69   :  { %445 = vmatpush1.bf16.msra.mxu0 %v1718_v56  ;;  %vm584_vm5 = vcmask 588800   ;;  %vm631_vm6 = vsmask.f32 5376  ;;  %vm657_vm8 = vsmask.f32 4352  ;;  %vm1022_vm10 = vcmask 523264  }
  0x6a   :  { %247 = vrot.lane.b32.xlu0 %v199_v62, %s1968_s6  ;;  %446 = vmatprep.subr.bf16.mxu0 %v1719_v61  ;;  %v323_v58 = vshrl.u32 %v322_v57, 7  ;;  %vm632_vm7 = vmand %vm213_vm3, %vm631_vm6 }
  0x6b   :  { %256 = vrot.lane.b32.xlu1 %v218_v2, %s1970_s13 }
  0x6c   :  { %v324_v59 = vsub.s32 0, %v323_v58  ;;  %v328_v61 = vsub.s32 1, %v323_v58 }
  0x6d   :  { %447 = vmatpush1.bf16.msra.mxu0 %v1721_v3 }
  0x6e   :  { %231 = vrot.lane.b32.xlu0 %v160_v6, %s1967_s4  ;;  %448 = vmatprep.subr.bf16.mxu0 %v1722_v5  ;;  %v325_v62 = vrot.slane %v320_v60, %v324_v59  ;;  %v329_v63 = vrot.slane %v320_v60, %v328_v61 }
  0x6f   :  { %240 = vrot.lane.b32.xlu1 %v182_v9, %s1969_s12 }
  0x71   :  { %449 = vmatpush1.bf16.msra.mxu0 %v1724_v12 }
  0x72   :  { %249 = vrot.lane.b32.xlu0 %v203_v13, %s1968_s6  ;;  %450 = vmatprep.subr.bf16.mxu0 %v1725_v10 }
  0x73   :  { %258 = vrot.lane.b32.xlu1 %v220_v15, %s1970_s13 }
  0x75   :  { %451 = vmatpush1.bf16.msra.mxu0 %v1727_v19 }
  0x76   :  { %233 = vrot.lane.b32.xlu0 %v170_v20, %s1967_s4  ;;  %1479 = vmatprep.subr.msk.bf16.mxu0 %vm213_vm3, %v1728_v18 }
  0x77   :  { %242 = vrot.lane.b32.xlu1 %v187_v22, %s1969_s12 }
  0x79   :  { %467 = vmatpush2.bf16.msra.mxu0 %v431_v24 }
  0x7a   :  { %251 = vrot.lane.b32.xlu0 %v212_v25, %s1968_s6 }
  0x7b   :  { %260 = vrot.lane.b32.xlu1 %v225_v26, %s1970_s13 }
  0xd0   :  { %v228_v27 = vpop.permute.xlu0 %227 }
  0xd1   :  { %v246_v28 = vpop.permute.xlu1 %245  ;;  %v264_v29 = vsel %vm262_vm11, %v2057_v4, %v228_v27 }
  0xd4   :  { %v237_v30 = vpop.permute.xlu0 %236 }
  0xd5   :  { %v273_v31 = vsel %vm271_vm12, %v264_v29, %v237_v30  ;;  %v255_v32 = vpop.permute.xlu1 %254 }
  0xd6   :  { %1480 = vmatprep.mubr.msk.bf16.mxu0 %vm420_vm13, %v255_v32  ;;  %v282_v33 = vsel %vm280_vm14, %v273_v31, %v246_v28 }
  0xd7   :  { %v291_v34 = vsel %vm289_vm15, %v282_v33, %v255_v32 }
  0xd8   :  { %469 = vmatmul.mubr.bf16.vlgmr.msra.gmra.mxu0 %v291_v34  ;;  %v230_v36 = vpop.permute.xlu0 %229 }
  0xd9   :  { %v266_v37 = vsel %vm262_vm11, %v2059_v7, %v230_v36  ;;  %v239_v38 = vpop.permute.xlu1 %238 }
  0xda   :  { %v275_v39 = vsel %vm271_vm12, %v266_v37, %v239_v38 }
  0xdc   :  { %v248_v4 = vpop.permute.xlu0 %247 }
  0xdd   :  { %v284_v40 = vsel %vm280_vm14, %v275_v39, %v248_v4  ;;  %v257_v41 = vpop.permute.xlu1 %256 }
  0xde   :  { %1481 = vmatprep.mubr.msk.bf16.mxu0 %vm420_vm13, %v257_v41  ;;  %v294_v42 = vsel %vm289_vm15, %v284_v40, %v257_v41 }
  0xe0   :  { %479 = vmatmul.mubr.bf16.gmra.mxu0 %v294_v42  ;;  %v232_v43 = vpop.permute.xlu0 %231 }
  0xe1   :  { %v268_v44 = vsel %vm262_vm11, %v2061_v8, %v232_v43  ;;  %v241_v45 = vpop.permute.xlu1 %240 }
  0xe2   :  { %v277_v46 = vsel %vm271_vm12, %v268_v44, %v241_v45 }
  0xe4   :  { %v250_v7 = vpop.permute.xlu0 %249 }
  0xe5   :  { %v286_v47 = vsel %vm280_vm14, %v277_v46, %v250_v7  ;;  %v259_v48 = vpop.permute.xlu1 %258  ;;  %v1731_v46 = vld [vmem:[#allocation10 + $0x78] sm:$0xff]  }
  0xe6   :  { %1482 = vmatprep.mubr.msk.bf16.mxu0 %vm420_vm13, %v259_v48  ;;  %v297_v49 = vsel %vm289_vm15, %v286_v47, %v259_v48  ;;  %v1732_v7 = vld [vmem:[#allocation10 + $0x38] sm:$0xff]   ;;  %v1733_v47 = vld [vmem:[#allocation10 + $0x70] sm:$0xff]   ;;  %1541 = vmatprep.subr.bf16.mxu1 %v1731_v46 }
  0xe7   :  { %1542 = vmatpush3.bf16.msra.mxu1 %v1732_v7  ;;  %v1734_v48 = vld [vmem:[#allocation10 + $0x30] sm:$0xff]  }
  0xe8   :  { %489 = vmatmul.mubr.bf16.gmra.mxu0 %v297_v49  ;;  %v234_v50 = vpop.permute.xlu0 %233  ;;  %1543 = vmatprep.subr.bf16.mxu1 %v1733_v47  ;;  %v1735_v49 = vld [vmem:[#allocation10 + $0x68] sm:$0xff]  }
  0xe9   :  { %v270_v51 = vsel %vm262_vm11, %v2082_v35, %v234_v50  ;;  %v243_v52 = vpop.permute.xlu1 %242  ;;  %v1736_v50 = vld [vmem:[#allocation10 + $0x28] sm:$0xff]   ;;  %vm1026_vm11 = vcmask 519168  }
  0xea   :  { %v279_v53 = vsel %vm271_vm12, %v270_v51, %v243_v52  ;;  %v1737_v51 = vld [vmem:[#allocation10 + $0x60] sm:$0xff]  }
  0xeb   :  { %1544 = vmatpush3.bf16.msra.mxu1 %v1734_v48  ;;  %v1738_v52 = vld [vmem:[#allocation10 + $0x20] sm:$0xff]  }
  0xec   :  { %v252_v8 = vpop.permute.xlu0 %251  ;;  %1545 = vmatprep.subr.bf16.mxu1 %v1735_v49 }
  0xed   :  { %v288_v54 = vsel %vm280_vm14, %v279_v53, %v252_v8  ;;  %v261_v55 = vpop.permute.xlu1 %260  ;;  %v1739_v53 = vld [vmem:[#allocation10 + $0x58] sm:$0xff]  }
  0xee   :  { %1483 = vmatprep.mubr.msk.bf16.mxu0 %vm420_vm13, %v261_v55  ;;  %v300_v56 = vsel %vm289_vm15, %v288_v54, %v261_v55  ;;  %v1740_v8 = vld [vmem:[#allocation10 + $0x18] sm:$0xff]   ;;  %v1741_v54 = vld [vmem:[#allocation10 + $0x50] sm:$0xff]   ;;  %vm1976_vm13 = vmmov 0  }
  0xef   :  { %1546 = vmatpush3.bf16.msra.mxu1 %v1736_v50  ;;  %v1742_v55 = vld [vmem:[#allocation10 + $0x10] sm:$0xff]  }
  0xf0   :  { %499 = vmatmul.mubr.bf16.gmra.mxu0 %v300_v56  ;;  %1547 = vmatprep.subr.bf16.mxu1 %v1737_v51  ;;  %v1743_v56 = vld [vmem:[#allocation10 + $0x48] sm:$0xff]  }
  0xf3   :  { %1548 = vmatpush3.bf16.msra.mxu1 %v1738_v52 }
  0xf4   :  { %1549 = vmatprep.subr.bf16.mxu1 %v1739_v53 }
  0xf7   :  { %1550 = vmatpush3.bf16.msra.mxu1 %v1740_v8 }
  0xf8   :  { %1551 = vmatprep.subr.bf16.mxu1 %v1741_v54 }
  0xfb   :  { %1552 = vmatpush3.bf16.msra.mxu1 %v1742_v55 }
  0xfc   :  { %1553 = vmatprep.subr.bf16.mxu1 %v1743_v56 }
 0x198   :  { %v470_v35 = vpop.f32.mrf.mxu0 }
 0x199   :  { %v2154_v0 = vadd.f32 %v470_v35, %v325_v62 }
 0x19a   :  { %v472_v1 = vpop.f32.mrf.mxu0 }
 0x19b   :  { %v507_v2 = vmax.f32 %v2154_v0, 0.0  ;;  %v473_v3 = vadd.f32 %v472_v1, %v329_v63 }
 0x19c   :  { %v474_v5 = vpop.f32.mrf.mxu0 }
 0x19d   :  { %v508_v6 = vmax.f32 %v473_v3, 0.0  ;;  %v2157_v11 = vadd.f32 %v474_v5, %v325_v62  ;;  %535 = vrot.lane.b32.xlu0 %v507_v2, %s1969_s12 }
 0x19e   :  { %v476_v9 = vpop.f32.mrf.mxu0 }
 0x19f   :  { %v509_v12 = vmax.f32 %v2157_v11, 0.0  ;;  %v477_v10 = vadd.f32 %v476_v9, %v329_v63  ;;  %537 = vrot.lane.b32.xlu1 %v508_v6, %s1969_s12 }
 0x1a0   :  { %v480_v13 = vpop.f32.mrf.mxu0 }
 0x1a1   :  { %v510_v14 = vmax.f32 %v477_v10, 0.0  ;;  %v2164_v15 = vadd.f32 %v480_v13, %v325_v62  ;;  %539 = vrot.lane.b32.xlu0 %v509_v12, %s1969_s12 }
 0x1a2   :  { %v482_v16 = vpop.f32.mrf.mxu0 }
 0x1a3   :  { %v511_v17 = vmax.f32 %v2164_v15, 0.0  ;;  %v483_v18 = vadd.f32 %v482_v16, %v329_v63  ;;  %541 = vrot.lane.b32.xlu1 %v510_v14, %s1969_s12 }
 0x1a4   :  { %v484_v19 = vpop.f32.mrf.mxu0 }
 0x1a5   :  { %v512_v20 = vmax.f32 %v483_v18, 0.0  ;;  %v2171_v21 = vadd.f32 %v484_v19, %v325_v62  ;;  %543 = vrot.lane.b32.xlu0 %v511_v17, %s1969_s12 }
 0x1a6   :  { %v486_v22 = vpop.f32.mrf.mxu0 }
 0x1a7   :  { %v513_v23 = vmax.f32 %v2171_v21, 0.0  ;;  %v487_v24 = vadd.f32 %v486_v22, %v329_v63  ;;  %545 = vrot.lane.b32.xlu1 %v512_v20, %s1969_s12 }
 0x1a8   :  { %v490_v25 = vpop.f32.mrf.mxu0 }
 0x1a9   :  { %v514_v26 = vmax.f32 %v487_v24, 0.0  ;;  %v2178_v27 = vadd.f32 %v490_v25, %v325_v62  ;;  %547 = vrot.lane.b32.xlu0 %v513_v23, %s1969_s12 }
 0x1aa   :  { %v492_v28 = vpop.f32.mrf.mxu0 }
 0x1ab   :  { %v515_v29 = vmax.f32 %v2178_v27, 0.0  ;;  %v493_v30 = vadd.f32 %v492_v28, %v329_v63  ;;  %549 = vrot.lane.b32.xlu1 %v514_v26, %s1969_s12 }
 0x1ac   :  { %v494_v31 = vpop.f32.mrf.mxu0 }
 0x1ad   :  { %v516_v32 = vmax.f32 %v493_v30, 0.0  ;;  %v2185_v33 = vadd.f32 %v494_v31, %v325_v62  ;;  %551 = vrot.lane.b32.xlu0 %v515_v29, %s1969_s12  ;;  %v1744_v30 = vld [vmem:[#allocation10 + $0x8] sm:$0xff]   ;;  %v1745_v31 = vld [vmem:[#allocation10 + $0x40] sm:$0xff]  }
 0x1ae   :  { %v496_v34 = vpop.f32.mrf.mxu0  ;;  %1554 = vmatpush3.bf16.msra.mxu1 %v1744_v30 }
 0x1af   :  { %v517_v36 = vmax.f32 %v2185_v33, 0.0  ;;  %v497_v37 = vadd.f32 %v496_v34, %v329_v63  ;;  %553 = vrot.lane.b32.xlu1 %v516_v32, %s1969_s12  ;;  %1555 = vmatprep.subr.bf16.mxu1 %v1745_v31 }
 0x1b0   :  { %v500_v38 = vpop.f32.mrf.mxu0 }
 0x1b1   :  { %v518_v39 = vmax.f32 %v497_v37, 0.0  ;;  %v2192_v4 = vadd.f32 %v500_v38, %v325_v62  ;;  %555 = vrot.lane.b32.xlu0 %v517_v36, %s1969_s12 }
 0x1b2   :  { %v502_v40 = vpop.f32.mrf.mxu0 }
 0x1b3   :  { %v519_v41 = vmax.f32 %v2192_v4, 0.0  ;;  %v503_v42 = vadd.f32 %v502_v40, %v329_v63  ;;  %557 = vrot.lane.b32.xlu1 %v518_v39, %s1969_s12  ;;  %v1747_v40 = vld [vmem:[#allocation10 + $0xb0] ss:$0 sps:$4 sm:$0xff]  }
 0x1b4   :  { %v504_v43 = vpop.f32.mrf.mxu0 }
 0x1b5   :  { %v520_v44 = vmax.f32 %v503_v42, 0.0  ;;  %559 = vrot.lane.b32.xlu0 %v519_v41, %s1969_s12 }
 0x1b6   :  { %v505_v45 = vpop.f32.mrf.mxu0 }
 0x1b7   :  { %561 = vrot.lane.b32.xlu1 %v520_v44, %s1969_s12 }
 0x20f   :  { %v536_v57 = vpop.permute.xlu0 %535 }
 0x211   :  { %v538_v58 = vpop.permute.xlu1 %537 }
 0x212   :  { %v563_v59 = vsel %vm271_vm12, %v536_v57, %v538_v58 }
 0x213   :  { %v577_v60 = vmax.f32 %v507_v2, %v563_v59  ;;  %v540_v61 = vpop.permute.xlu0 %539 }
 0x215   :  { %585 = vst.msk [vmem:[#allocation2] sm:$0xff] %vm584_vm5, %v577_v60  ;;  %v542_v62 = vpop.permute.xlu1 %541 }
 0x216   :  { %v564_v63 = vsel %vm271_vm12, %v540_v61, %v542_v62 }
 0x217   :  { %v578_v35 = vmax.f32 %v509_v12, %v564_v63  ;;  %v544_v1 = vpop.permute.xlu0 %543 }
 0x219   :  { %586 = vst.msk [vmem:[#allocation2 + $0x8] sm:$0xff] %vm584_vm5, %v578_v35  ;;  %v546_v3 = vpop.permute.xlu1 %545 }
 0x21a   :  { %v565_v5 = vsel %vm271_vm12, %v544_v1, %v546_v3 }
 0x21b   :  { %v579_v6 = vmax.f32 %v511_v17, %v565_v5  ;;  %v548_v0 = vpop.permute.xlu0 %547 }
 0x21d   :  { %587 = vst.msk [vmem:[#allocation2 + $0x10] sm:$0xff] %vm584_vm5, %v579_v6  ;;  %v550_v2 = vpop.permute.xlu1 %549 }
 0x21e   :  { %v566_v9 = vsel %vm271_vm12, %v548_v0, %v550_v2 }
 0x21f   :  { %v580_v10 = vmax.f32 %v513_v23, %v566_v9  ;;  %v552_v11 = vpop.permute.xlu0 %551 }
 0x220   :  { %v592_v23 = vld [vmem:[#allocation2] ss:$2 sm:$0xff]  ;;  %v600_v24 = vld [vmem:[#allocation2 + $0x1] ss:$2 sm:$0xff] }
 0x221   :  { %588 = vst.msk [vmem:[#allocation2 + $0x18] sm:$0xff] %vm584_vm5, %v580_v10  ;;  %v554_v12 = vpop.permute.xlu1 %553  ;;  %v607_v28 = vmax.f32 %v592_v23, %v600_v24  ;;  %v1750_v24 = vld [vmem:[#allocation10 + $0x98] sm:$0xff]  }
 0x222   :  { %v567_v13 = vsel %vm271_vm12, %v552_v11, %v554_v12 }
 0x223   :  { %v581_v14 = vmax.f32 %v515_v29, %v567_v13  ;;  %v556_v15 = vpop.permute.xlu0 %555 }
 0x225   :  { %589 = vst.msk [vmem:[#allocation2 + $0x20] sm:$0xff] %vm584_vm5, %v581_v14  ;;  %v558_v16 = vpop.permute.xlu1 %557 }
 0x226   :  { %v568_v17 = vsel %vm271_vm12, %v556_v15, %v558_v16  ;;  %v898_v15 = vsel %vm167_vm4, %v1747_v40, 0  ;;  %v1748_v16 = vld [vmem:[#allocation10 + $0xa8] sm:$0xff]  }
 0x227   :  { %v582_v18 = vmax.f32 %v517_v36, %v568_v17  ;;  %v560_v21 = vpop.permute.xlu0 %559  ;;  %v1746_v36 = vld [vmem:[#allocation10] sm:$0xff]  }
 0x228   :  { %v594_v19 = vld [vmem:[#allocation2 + $0x10] ss:$2 sm:$0xff]  ;;  %v602_v20 = vld [vmem:[#allocation2 + $0x11] ss:$2 sm:$0xff]  ;;  %1556 = vmatpush3.bf16.msra.mxu1 %v1746_v36 }
 0x229   :  { %590 = vst.msk [vmem:[#allocation2 + $0x28] sm:$0xff] %vm584_vm5, %v582_v18  ;;  %v562_v22 = vpop.permute.xlu1 %561  ;;  %v608_v26 = vmax.f32 %v594_v19, %v602_v20  ;;  %1676 = vmatprep.subr.msk.bf16.mxu1 %vm167_vm4, %v1747_v40 }
 0x22a   :  { %v569_v25 = vsel %vm271_vm12, %v560_v21, %v562_v22  ;;  %v1749_v21 = vld [vmem:[#allocation10 + $0xa0] sm:$0xff]   ;;  %vm1038_vm12 = vcmask 521216  }
 0x22b   :  { %v583_v27 = vmax.f32 %v519_v41, %v569_v25  ;;  %v2231_v29 = vpack.c.bf16 %v608_v26, %v607_v28  ;;  %v1752_v28 = vld [vmem:[#allocation10 + $0x88] sm:$0xff]  }
 0x22d   :  { %591 = vst.msk [vmem:[#allocation2 + $0x30] sm:$0xff] %vm584_vm5, %v583_v27  ;;  %v616_v34 = vshll.u32 %v2231_v29, 16  ;;  %v614_v41 = vshrl.u32 %v2231_v29, 16  ;;  %v636_v44 = vrot.slane %v2231_v29, 1  ;;  %v639_v35 = vrot.slane %v2231_v29, 3  ;;  %v1751_v27 = vld [vmem:[#allocation10 + $0x90] sm:$0xff]  }
 0x22e   :  { %v663_v5 = vrot.slane %v2231_v29, 4  ;;  %v660_v0 = vrot.slane %v2231_v29, 2 }
 0x22f   :  { %v618_v42 = vrot.slane %v616_v34, 1  ;;  %v644_v48 = vrot.slane %v614_v41, 1  ;;  %v645_v49 = vrot.slane %v616_v34, 2  ;;  %v629_v8 = vrot.slane %v616_v34, 3 }
 0x230   :  { %v596_v32 = vld [vmem:[#allocation2 + $0x20] ss:$2 sm:$0xff]  ;;  %v604_v33 = vld [vmem:[#allocation2 + $0x21] ss:$2 sm:$0xff]  ;;  %v652_v54 = vrot.slane %v614_v41, 3  ;;  %v653_v58 = vrot.slane %v616_v34, 4 }
 0x231   :  { %v609_v39 = vmax.f32 %v596_v32, %v604_v33  ;;  %v619_v47 = vor.u32 %v618_v42, %v614_v41  ;;  %v646_v60 = vor.u32 %v645_v49, %v644_v48  ;;  %v756_v41 = vld [vmem:[#allocation11 + $0x1] ss:$0 sm:$0xff] }
 0x232   :  { %v654_v62 = vor.u32 %v653_v58, %v652_v54 }
 0x234   :  { %v598_v37 = vld [vmem:[#allocation2 + $0x30] ss:$2 sm:$0xf]  ;;  %v606_v38 = vld [vmem:[#allocation2 + $0x31] ss:$2 sm:$0xf] }
 0x235   :  { %v610_v4 = vmax.f32 %v598_v37, %v606_v38 }
 0x237   :  { %v2235_v43 = vpack.c.bf16 %v610_v4, %v609_v39 }
 0x239   :  { %v637_v45 = vrot.slane %v2235_v43, 1  ;;  %v621_v46 = vshll.u32 %v2235_v43, 16  ;;  %v625_v7 = vshrl.u32 %v2235_v43, 16  ;;  %v661_v1 = vrot.slane %v2235_v43, 2 }
 0x23b   :  { %v638_v50 = vsel %vm175_vm2, %v636_v44, %v637_v45  ;;  %v623_v51 = vrot.slane %v621_v46, 1  ;;  %v647_v52 = vrot.slane %v625_v7, 1  ;;  %v648_v53 = vrot.slane %v621_v46, 2 }
 0x23c   :  { %674 = vrot.lane.b32.xlu1 %v638_v50, %s1971_s14  ;;  %vm640_vm2 = vcmask 1044480   ;;  %v667_v6 = vsel %vm167_vm4, %v661_v1, %v663_v5  ;;  %v662_v2 = vsel %vm213_vm3, %v660_v0, %v661_v1  ;;  %vm892_vm3 = vcmask 850944   ;;  %v1760_v1 = vld [vmem:[#allocation13 + $0x60] sm:$0xff]   ;;  %v1762_v5 = vld [vmem:[#allocation13 + $0x58] sm:$0xff]   ;;  %v1764_v0 = vld [vmem:[#allocation13 + $0x50] sm:$0xff]  }
 0x23d   :  { %v624_v55 = vsel %vm132_vm0, %v619_v47, %v623_v51  ;;  %v627_v56 = vor.u32 %v625_v7, %v623_v51  ;;  %v649_v57 = vor.u32 %v648_v53, %v647_v52  ;;  %vm658_vm9 = vmand %vm640_vm2, %vm657_vm8  ;;  %v643_v3 = vsel %vm640_vm2, %v637_v45, %v639_v35  ;;  %v1759_v35 = vld [vmem:[#allocation13 + $0x28] sm:$0xff]  }
 0x23e   :  { %669 = vrot.lane.b32.xlu0 %v624_v55, %s1972_s15  ;;  %vm694_vm0 = vcmask 130048   ;;  %vm706_vm4 = vcmask 261120  }
 0x23f   :  { %v633_v59 = vsel %vm632_vm7, %v627_v56, %v629_v8  ;;  %v650_v61 = vsel %vm188_vm1, %v646_v60, %v649_v57  ;;  %v659_v63 = vsel %vm658_vm9, %v649_v57, %v654_v62  ;;  %vm699_vm1 = vcmask 719872   ;;  %v1755_v60 = vld [vmem:[#allocation13 + $0x38] sm:$0xff]   ;;  %v1757_v62 = vld [vmem:[#allocation13 + $0x30] sm:$0xff]  }
 0x240   :  { %671 = vrot.lane.b32.xlu1 %v633_v59, %s1972_s15  ;;  %v1754_v59 = vld [vmem:[#allocation13 + $0x78] sm:$0xff]  }
 0x241   :  { %1578 = vmatprep.subr.bf16.mxu0 %v1754_v59 }
 0x242   :  { %679 = vrot.lane.b32.xlu0 %v650_v61, %s1973_s16  ;;  %v1756_v61 = vld [vmem:[#allocation13 + $0x70] sm:$0xff]   ;;  %1579 = vmatpush3.bf16.msra.mxu0 %v1755_v60 }
 0x243   :  { %1580 = vmatprep.subr.bf16.mxu0 %v1756_v61  ;;  %v1784_v61 = vld [vmem:[#allocation16 + $0x8] sm:$0xff]  }
 0x244   :  { %681 = vrot.lane.b32.xlu1 %v659_v63, %s1973_s16  ;;  %v1758_v63 = vld [vmem:[#allocation13 + $0x68] sm:$0xff]  }
 0x246   :  { %676 = vrot.lane.b32.xlu0 %v643_v3, %s1971_s14  ;;  %1581 = vmatpush3.bf16.msra.mxu0 %v1757_v62  ;;  %v1761_v3 = vld [vmem:[#allocation13 + $0x20] sm:$0xff]  }
 0x247   :  { %1582 = vmatprep.subr.bf16.mxu0 %v1758_v63  ;;  %v1785_v62 = vld [vmem:[#allocation16] sm:$0xff]   ;;  %v1246_v63 = vld [vmem:[#allocation11 + $0x3] ss:$0 sm:$0xff] }
 0x248   :  { %686 = vrot.lane.b32.xlu1 %v667_v6, %s1974_s17  ;;  %v1763_v6 = vld [vmem:[#allocation13 + $0x18] sm:$0xff]  }
 0x24a   :  { %684 = vrot.lane.b32.xlu0 %v662_v2, %s1974_s17  ;;  %1583 = vmatpush3.bf16.msra.mxu0 %v1759_v35  ;;  %v1765_v2 = vld [vmem:[#allocation13 + $0x10] sm:$0xff]  }
 0x24b   :  { %1584 = vmatprep.subr.bf16.mxu0 %v1760_v1 }
 0x24e   :  { %1585 = vmatpush3.bf16.msra.mxu0 %v1761_v3 }
 0x24f   :  { %1586 = vmatprep.subr.bf16.mxu0 %v1762_v5 }
 0x252   :  { %1587 = vmatpush3.bf16.msra.mxu0 %v1763_v6 }
 0x253   :  { %1588 = vmatprep.subr.bf16.mxu0 %v1764_v0 }
 0x256   :  { %1589 = vmatpush3.bf16.msra.mxu0 %v1765_v2 }
 0x2ae   :  { %v675_v9 = vpop.permute.xlu1 %674 }
 0x2b0   :  { %v670_v10 = vpop.permute.xlu0 %669 }
 0x2b1   :  { %v696_v12 = vsel %vm694_vm0, %v670_v10, %v675_v9  ;;  %v689_v17 = vsel %vm584_vm5, %v2231_v29, %v670_v10  ;;  %v1753_v29 = vld [vmem:[#allocation10 + $0x80] sm:$0xff]   ;;  %v1766_v9 = vld [vmem:[#allocation13 + $0x48] sm:$0xff]  }
 0x2b2   :  { %v672_v11 = vpop.permute.xlu1 %671  ;;  %v1767_v10 = vld [vmem:[#allocation13 + $0x8] sm:$0xff]   ;;  %1590 = vmatprep.subr.bf16.mxu0 %v1766_v9  ;;  %v1353_v9 = vld [vmem:[#allocation11 + $0x4] ss:$0 sm:$0xff] }
 0x2b3   :  { %v692_v25 = vsel %vm584_vm5, %v2235_v43, %v672_v11  ;;  %1591 = vmatpush3.bf16.msra.mxu0 %v1767_v10 }
 0x2b4   :  { %v680_v13 = vpop.permute.xlu0 %679 }
 0x2b5   :  { %v701_v14 = vsel %vm699_vm1, %v696_v12, %v680_v13 }
 0x2b6   :  { %932 = vmatprep.mubr.bf16.mxu1 %v701_v14  ;;  %v682_v19 = vpop.permute.xlu1 %681 }
 0x2b7   :  { %933 = vmatmul.mubr.bf16.vlgmr.msra.gmra.mxu1 %v689_v17 }
 0x2b8   :  { %1619 = vmatpush3.bf16.msra.mxu1 %v898_v15  ;;  %v677_v18 = vpop.permute.xlu0 %676 }
 0x2b9   :  { %v698_v20 = vsel %vm694_vm0, %v672_v11, %v677_v18  ;;  %1620 = vmatprep.subr.bf16.mxu1 %v1748_v16 }
 0x2ba   :  { %v704_v22 = vsel %vm699_vm1, %v698_v20, %v682_v19  ;;  %v687_v30 = vpop.permute.xlu1 %686 }
 0x2bb   :  { %940 = vmatprep.mubr.bf16.mxu1 %v704_v22  ;;  %v710_v31 = vsel %vm706_vm4, %v682_v19, %v687_v30 }
 0x2bc   :  { %1621 = vmatpush3.bf16.msra.mxu1 %v1748_v16  ;;  %v685_v23 = vpop.permute.xlu0 %684 }
 0x2bd   :  { %1622 = vmatprep.subr.bf16.mxu1 %v1749_v21  ;;  %v708_v26 = vsel %vm706_vm4, %v680_v13, %v685_v23 }
 0x2bf   :  { %941 = vmatmul.mubr.bf16.gmra.mxu1 %v692_v25  ;;  %v1768_v25 = vld [vmem:[#allocation13 + $0x40] sm:$0xff]  }
 0x2c0   :  { %1623 = vmatpush3.bf16.msra.mxu1 %v1749_v21  ;;  %1632 = vmatprep.mubr.msk.bf16.mxu1 %vm892_vm3, %v708_v26  ;;  %v1769_v26 = vld [vmem:[#allocation13] sm:$0xff]  }
 0x2c1   :  { %1624 = vmatprep.subr.bf16.mxu1 %v1750_v24  ;;  %1592 = vmatprep.subr.bf16.mxu0 %v1768_v25 }
 0x2c2   :  { %1593 = vmatpush3.bf16.msra.mxu0 %v1769_v26 }
 0x2c4   :  { %1625 = vmatpush3.bf16.msra.mxu1 %v1750_v24 }
 0x2c5   :  { %1626 = vmatprep.subr.bf16.mxu1 %v1751_v27 }
 0x2c8   :  { %1627 = vmatpush3.bf16.msra.mxu1 %v1751_v27  ;;  %v1770_v27 = vld [vmem:[#allocation14 + $0x38] sm:$0xff]  }
 0x2c9   :  { %1628 = vmatprep.subr.bf16.mxu1 %v1752_v28 }
 0x2cc   :  { %1629 = vmatpush3.bf16.msra.mxu1 %v1752_v28  ;;  %v1975_v28 = vmov 0.0  }
 0x2cd   :  { %1630 = vmatprep.subr.bf16.mxu1 %v1753_v29  ;;  %1656 = vmatprep.subr.bf16.mxu0 %v1975_v28 }
 0x2d0   :  { %1631 = vmatpush3.bf16.msra.mxu1 %v1753_v29  ;;  %v1771_v29 = vld [vmem:[#allocation14 + $0x30] sm:$0xff]  }
 0x2d1   :  { %1636 = vmatprep.subr.bf16.mxu1 %v1975_v28 }
 0x2d3   :  { %1633 = vmatmul.mubr.msk.bf16.vlgmr.msra.gmra.mxu1 %vm892_vm3, %v710_v31 }
 0x2d4   :  { %1637 = vmatpush3.bf16.msra.mxu1 %v1770_v27  ;;  %1652 = vmatprep.mubr.msk.bf16.mxu1 %vm1976_vm13, %v1975_v28 }
 0x2d5   :  { %1638 = vmatprep.subr.bf16.mxu1 %v1975_v28 }
 0x2d8   :  { %1639 = vmatpush3.bf16.msra.mxu1 %v1771_v29 }
 0x2d9   :  { %1640 = vmatprep.subr.bf16.mxu1 %v1975_v28 }
 0x377   :  { %v1557_v32 = vpop.f32.mrf.mxu1 }
 0x379   :  { %v1558_v33 = vpop.f32.mrf.mxu1 }
 0x37a   :  { %v1559_v4 = vadd.f32 %v1558_v33, %v1557_v32  ;;  %v1772_v33 = vld [vmem:[#allocation14 + $0x28] sm:$0xff]  }
 0x37b   :  { %v1560_v34 = vpop.f32.mrf.mxu1  ;;  %1641 = vmatpush3.bf16.msra.mxu1 %v1772_v33 }
 0x37c   :  { %v935_v45 = vadd.f32 %v1559_v4, %v756_v41  ;;  %1642 = vmatprep.subr.bf16.mxu1 %v1975_v28 }
 0x37d   :  { %v1561_v36 = vpop.f32.mrf.mxu1 }
 0x37e   :  { %v1562_v44 = vadd.f32 %v1561_v36, %v1560_v34  ;;  %v1773_v34 = vld [vmem:[#allocation14 + $0x20] sm:$0xff]   ;;  %v1774_v36 = vld [vmem:[#allocation14 + $0x18] sm:$0xff]  }
 0x37f   :  { %v1563_v37 = vpop.f32.mrf.mxu1  ;;  %1643 = vmatpush3.bf16.msra.mxu1 %v1773_v34 }
 0x380   :  { %v938_v52 = vadd.f32 %v1562_v44, %v756_v41  ;;  %1644 = vmatprep.subr.bf16.mxu1 %v1975_v28 }
 0x381   :  { %v1564_v38 = vpop.f32.mrf.mxu1 }
 0x382   :  { %v1565_v42 = vadd.f32 %v1564_v38, %v1563_v37 }
 0x383   :  { %v1566_v39 = vpop.f32.mrf.mxu1  ;;  %1645 = vmatpush3.bf16.msra.mxu1 %v1774_v36 }
 0x384   :  { %v943_v47 = vadd.f32 %v1565_v42, %v756_v41  ;;  %1646 = vmatprep.subr.bf16.mxu1 %v1975_v28 }
 0x385   :  { %v1567_v40 = vpop.f32.mrf.mxu1 }
 0x386   :  { %v1568_v7 = vadd.f32 %v1567_v40, %v1566_v39 }
 0x388   :  { %v946_v8 = vadd.f32 %v1568_v7, %v756_v41  ;;  %v1777_v7 = vld [vmem:[#allocation14] sm:$0xff]  }
 0x393   :  { %v1634_v43 = vpop.f32.mrf.mxu1 }
 0x394   :  { %v992_v50 = vadd.f32 %v1634_v43, %v943_v47  ;;  %v1778_v47 = vld [vmem:[#allocation16 + $0x38] sm:$0xff]  }
 0x395   :  { %v983_v46 = vpop.f32.mrf.mxu1 }
 0x396   :  { %v984_v48 = vadd.f32 %v983_v46, %v935_v45  ;;  %v1000_v55 = vmax.f32 %v992_v50, 0.0  ;;  %v1775_v45 = vld [vmem:[#allocation14 + $0x10] sm:$0xff]   ;;  %v1776_v46 = vld [vmem:[#allocation14 + $0x8] sm:$0xff]   ;;  %v1781_v50 = vld [vmem:[#allocation16 + $0x20] sm:$0xff]  }
 0x397   :  { %v1635_v49 = vpop.f32.mrf.mxu1  ;;  %1647 = vmatpush3.bf16.msra.mxu1 %v1775_v45 }
 0x398   :  { %v998_v51 = vmax.f32 %v984_v48, 0.0  ;;  %v995_v56 = vadd.f32 %v1635_v49, %v946_v8  ;;  %1648 = vmatprep.subr.bf16.mxu1 %v1975_v28  ;;  %v1779_v48 = vld [vmem:[#allocation16 + $0x30] sm:$0xff]   ;;  %v1780_v49 = vld [vmem:[#allocation16 + $0x28] sm:$0xff]  }
 0x399   :  { %v986_v53 = vpop.f32.mrf.mxu1  ;;  %v1091_v8 = vld [vmem:[#allocation11 + $0x2] ss:$0 sm:$0xff] }
 0x39a   :  { %v987_v54 = vadd.f32 %v986_v53, %v938_v52  ;;  %1006 = vrot.lane.b32.xlu0 %v998_v51, %s1962_s1  ;;  %v1001_v58 = vmax.f32 %v995_v56, 0.0  ;;  %v1783_v52 = vld [vmem:[#allocation16 + $0x10] sm:$0xff]  }
 0x39b   :  { %1649 = vmatpush3.bf16.msra.mxu1 %v1776_v46 }
 0x39c   :  { %v999_v57 = vmax.f32 %v987_v54, 0.0  ;;  %1650 = vmatprep.subr.bf16.mxu1 %v1975_v28 }
 0x39e   :  { %1008 = vrot.lane.b32.xlu1 %v999_v57, %s1962_s1  ;;  %1010 = vrot.lane.b32.xlu0 %v1000_v55, %s1962_s1 }
 0x39f   :  { %1651 = vmatpush3.bf16.msra.mxu1 %v1777_v7 }
 0x3a2   :  { %1012 = vrot.lane.b32.xlu1 %v1001_v58, %s1962_s1 }
 0x40c   :  { %v1007_v11 = vpop.permute.xlu0 %1006 }
 0x40d   :  { %v1018_v12 = vmax.f32 %v998_v51, %v1007_v11  ;;  %v1782_v51 = vld [vmem:[#allocation16 + $0x18] sm:$0xff]  }
 0x40f   :  { %1023 = vst.msk [vmem:[#allocation3] sm:$0xff] %vm1022_vm10, %v1018_v12 }
 0x410   :  { %v1009_v13 = vpop.permute.xlu1 %1008  ;;  %v1011_v14 = vpop.permute.xlu0 %1010 }
 0x411   :  { %v1019_v15 = vmax.f32 %v999_v57, %v1009_v13  ;;  %v1020_v16 = vmax.f32 %v1000_v55, %v1011_v14 }
 0x413   :  { %1024 = vst.msk [vmem:[#allocation3 + $0x8] sm:$0xff] %vm1022_vm10, %v1019_v15  ;;  %1025 = vst.msk [vmem:[#allocation3 + $0x10] sm:$0xff] %vm1022_vm10, %v1020_v16 }
 0x414   :  { %v1013_v17 = vpop.permute.xlu1 %1012 }
 0x415   :  { %v1021_v18 = vmax.f32 %v1001_v58, %v1013_v17 }
 0x417   :  { %1027 = vst.msk [vmem:[#allocation3 + $0x18] sm:$0xf] %vm1026_vm11, %v1021_v18 }
 0x41a   :  { %v1028_v19 = vld [vmem:[#allocation3] ss:$2 sm:$0xff]  ;;  %v1032_v20 = vld [vmem:[#allocation3 + $0x1] ss:$2 sm:$0xff] }
 0x41b   :  { %v1035_v21 = vmax.f32 %v1028_v19, %v1032_v20 }
 0x41d   :  { %1037 = vst.msk [vmem:[#allocation4] sm:$0xff] %vm1022_vm10, %v1035_v21 }
 0x41e   :  { %v1030_v22 = vld [vmem:[#allocation3 + $0x10] ss:$2 sm:$0x3f]  ;;  %v1034_v23 = vld [vmem:[#allocation3 + $0x11] ss:$2 sm:$0x3f] }
 0x41f   :  { %v1036_v24 = vmax.f32 %v1030_v22, %v1034_v23 }
 0x421   :  { %1039 = vst.msk [vmem:[#allocation4 + $0x8] sm:$0x3f] %vm1038_vm12, %v1036_v24 }
 0x424   :  { %v1040_v4 = vld [vmem:[#allocation4] ss:$7 sm:$0x3] }
 0x428   :  { %v1042_v30 = vld [vmem:[#allocation4 + $0x1] ss:$7 sm:$0x3]  ;;  %v1046_v31 = vld [vmem:[#allocation4 + $0x3] ss:$7 sm:$0x3] }
 0x429   :  { %v1699_v32 = vpack.i.bf16 %v1042_v30, %v1046_v31  ;;  %v1044_v40 = vld [vmem:[#allocation4 + $0x2] ss:$7 sm:$0x3] }
 0x42b   :  { %1700 = vrot.lane.b32.xlu0 %v1699_v32, %s1962_s1  ;;  %s1977_s1 = smov [#allocation17]  }
 0x42c   :  { %s1449_s18 = sshll.u32 %s1977_s1, 4  ;;  %s1450_s18 = int_to_ptr.vmem [resolvable:$true] %s1449_s18 }
 0x42d   :  { %s1926_s19 = scalar_lea.vmem %s1450_s18, 32  ;;  %p1931_p8 = scmp.lt.s32.totalorder %s1450_s18, %s1450_s18 }
 0x42e   :  { %p1927_p7 = scmp.ne.s32.totalorder %s1450_s18, %s1926_s19  ;;  %p1932_p9 = scmp.lt.s32.totalorder %s1926_s19, %s1926_s19 }
 0x430   :  { %p1933_p10 = por %p1932_p9, %p1931_p8 }
 0x432   :  { %p1934_p11 = pnand %p1933_p10, %p1927_p7 }
 0x49d   :  { %v1701_v37 = vpop.permute.xlu0 %1700 }
 0x49e   :  { %v1703_v38 = vunpack.i.h.bf16 %v1701_v37  ;;  %v1702_v39 = vunpack.i.l.bf16 %v1701_v37 }
 0x4a0   :  { %v1055_v41 = vsel %vm1022_vm10, %v1040_v4, %v1703_v38  ;;  %v1056_v42 = vsel %vm1022_vm10, %v1044_v40, %v1702_v39 }
 0x4a1   :  { %v1057_v43 = vpack.c.bf16 %v1055_v41, %v1055_v41  ;;  %v1058_v44 = vpack.c.bf16 %v1056_v42, %v1056_v42 }
 0x4a3   :  { %1220 = vmatprep.mubr.bf16.mxu0 %v1058_v44 }
 0x4a4   :  { %1221 = vmatmul.mubr.bf16.vlgmr.msra.gmra.mxu0 %v1057_v43 }
 0x4a5   :  { %1672 = vmatprep.mubr.msk.bf16.mxu0 %vm1976_vm13, %v1975_v28  ;;  %1657 = vmatpush3.bf16.msra.mxu0 %v1778_v47 }
 0x4a6   :  { %1658 = vmatprep.subr.bf16.mxu0 %v1975_v28 }
 0x4a9   :  { %1659 = vmatpush3.bf16.msra.mxu0 %v1779_v48 }
 0x4aa   :  { %1660 = vmatprep.subr.bf16.mxu0 %v1975_v28 }
 0x4ad   :  { %1661 = vmatpush3.bf16.msra.mxu0 %v1780_v49 }
 0x4ae   :  { %1662 = vmatprep.subr.bf16.mxu0 %v1975_v28 }
 0x4b1   :  { %1663 = vmatpush3.bf16.msra.mxu0 %v1781_v50 }
 0x4b2   :  { %1664 = vmatprep.subr.bf16.mxu0 %v1975_v28 }
 0x4b5   :  { %1665 = vmatpush3.bf16.msra.mxu0 %v1782_v51 }
 0x4b6   :  { %1666 = vmatprep.subr.bf16.mxu0 %v1975_v28 }
 0x4b9   :  { %1667 = vmatpush3.bf16.msra.mxu0 %v1783_v52 }
 0x4ba   :  { %1668 = vmatprep.subr.bf16.mxu0 %v1975_v28 }
 0x4bd   :  { %1669 = vmatpush3.bf16.msra.mxu0 %v1784_v61 }
 0x4be   :  { %1670 = vmatprep.subr.bf16.mxu0 %v1975_v28 }
 0x4c1   :  { %1671 = vmatpush3.bf16.msra.mxu0 %v1785_v62 }
 0x564   :  { %v1594_v53 = vpop.f32.mrf.mxu0 }
 0x566   :  { %v1595_v54 = vpop.f32.mrf.mxu0 }
 0x567   :  { %v1596_v55 = vadd.f32 %v1595_v54, %v1594_v53 }
 0x568   :  { %v1597_v56 = vpop.f32.mrf.mxu0 }
 0x569   :  { %v1223_v57 = vadd.f32 %v1596_v55, %v1091_v8 }
 0x56a   :  { %v1598_v58 = vpop.f32.mrf.mxu0 }
 0x56b   :  { %v1228_v59 = vmax.f32 %v1223_v57, 0.0 }
 0x56d   :  { %v1229_v60 = vpack.c.bf16 %v1228_v59, %v1228_v59 }
 0x56f   :  { %1653 = vmatmul.mubr.bf16.vlgmr.msra.gmra.mxu1 %v1229_v60 }
 0x62f   :  { %v1329_v35 = vpop.f32.mrf.mxu1 }
 0x630   :  { %v1330_v1 = vadd.f32 %v1329_v35, %v1246_v63 }
 0x631   :  { %v1654_v3 = vpop.f32.mrf.mxu1 }
 0x632   :  { %v1335_v5 = vmax.f32 %v1330_v1, 0.0 }
 0x633   :  { %v1332_v6 = vpop.f32.mrf.mxu1 }
 0x634   :  { %v1336_v0 = vpack.c.bf16 %v1335_v5, %v1335_v5 }
 0x635   :  { %v1655_v2 = vpop.f32.mrf.mxu1 }
 0x636   :  { %1673 = vmatmul.mubr.bf16.vlgmr.msra.gmra.mxu0 %v1336_v0 }
 0x6f6   :  { %v1436_v10 = vpop.f32.mrf.mxu0 }
 0x6f7   :  { %v1437_v11 = vadd.f32 %v1436_v10, %v1353_v9 }
 0x6f8   :  { %v1674_v12 = vpop.f32.mrf.mxu0 }
 0x6f9   :  { %1442 = vst [vmem:[#allocation17] sm:$0x3] %v1437_v11 }
 0x6fa   :  { %v1439_v13 = vpop.f32.mrf.mxu0 }
 0x6fb   :  { %1937 = shalt.err (!%p1934_p11)
}
 0x6fc   :  { %1452 = dma.vmem_to_hbm [thread:$0]  %s1450_s18, 32, %s2303_s7, [#allocation7]   ;;  %v1675_v14 = vpop.f32.mrf.mxu0 }
 0x6fd   :  { %1954 = dma.done.wait [#allocation7], 32  }
 0x6fe   :  { %1955 = vsyncadd [#allocation7], 4294967264 }
 0x6ff   :  { %1456 = vsyncpa [#allocation6], 1 }
 0x700   :  { %1457 = vsyncpa [#allocation9], 1 }
 0x701   :  { %1458 = vsyncpa [#allocation12], 1 }
 0x702   :  { %1459 = vsyncpa [#allocation15], 1 }
 0x703   :  { %1460 = vsyncpa [#allocation7], 1 }

</bundles_post_ra>
